<compile_context>
chip_gen: v7x
topology: tpu7x:2x2x1
jax: 0.10.0
libtpu: 0.0.40
codegen_flags: <defaults>
</compile_context>

<pallas_src>
import functools

import numpy as np
import jax
import jax.numpy as jnp
from jax import lax
from jax.experimental import pallas as pl
from jax.experimental.pallas import tpu as pltpu

TEMPERATURE = 2.0     # Class_Rank default temperature=2
SOFT_LAMBDA = 0.8     # soft_lambda=0.8 passed to every RnC loss
N_LAB = 10            # green(3) + red(3) + trans(3) + sym flag(1)


# --------------------------------------------------------------------------
# Pallas kernel: one "super-tile" (P packed class groups) per grid step
# --------------------------------------------------------------------------
def _class_rank_kernel(nv_ref, var_ref,                  # scalar prefetch (SMEM)
                       f_ref, ft_ref, lab_ref, labT_ref,  # VMEM inputs
                       out_ref,                           # VMEM output
                       ld_sc, lg_sc,                      # VMEM scratch
                       *, n_pad, P, temperature, soft_lambda):
    gi = pl.program_id(0)
    M = P * n_pad
    f32 = jnp.float32

    f = f_ref[0].astype(f32)          # [M, D]
    ft = ft_ref[0].astype(f32)        # [D, M]
    lab = lab_ref[0].astype(f32)      # [M, N_LAB]
    labT = labT_ref[0].astype(f32)    # [N_LAB, M]

    # ---- per-row / per-lane group metadata (built from iota + SMEM scalars;
    #      no integer div/mod so everything stays plain VPU compares) --------
    row_idx = lax.broadcasted_iota(jnp.int32, (M, 1), 0)
    col_idx = lax.broadcasted_iota(jnp.int32, (1, M), 1)
    nv_col = jnp.zeros((1, M), jnp.int32)
    nv_row = jnp.zeros((M, 1), jnp.int32)
    var_col = jnp.zeros((1, M), jnp.int32)
    col_l = col_idx
    row_l = row_idx
    col_in = []
    kmax = jnp.int32(0)
    for p in range(P):
        nv_p = nv_ref[gi, p]
        var_p = var_ref[gi, p]
        in_col = jnp.logical_and(col_idx >= p * n_pad, col_idx < (p + 1) * n_pad)
        in_row = jnp.logical_and(row_idx >= p * n_pad, row_idx < (p + 1) * n_pad)
        nv_col = jnp.where(in_col, nv_p, nv_col)
        nv_row = jnp.where(in_row, nv_p, nv_row)
        var_col = jnp.where(in_col, var_p, var_col)
        col_l = jnp.where(in_col, col_idx - p * n_pad, col_l)
        row_l = jnp.where(in_row, row_idx - p * n_pad, row_l)
        col_in.append(in_col)
        kmax = jnp.maximum(kmax, nv_p)

    # ---- pairwise feature L2 distance over the whole super-tile -----------
    # bf16 Gram on the MXU (f32 accumulation); squared norms stay f32.
    gram = lax.dot_general(f.astype(jnp.bfloat16), ft.astype(jnp.bfloat16),
                           (((1,), (0,)), ((), ())),
                           preferred_element_type=jnp.float32)       # [M, M]
    sq_col = jnp.sum(f * f, axis=1, keepdims=True)                   # [M, 1]
    sq_row = jnp.sum(ft * ft, axis=0, keepdims=True)                 # [1, M]
    d2 = jnp.maximum(sq_col + sq_row - 2.0 * gram, 0.0)
    dist = jnp.sqrt(d2)
    # Row max of the logits is the (==0-ish) diagonal, which never enters the
    # denominators or positives, so the usual max-subtraction stays removed.
    logits = dist * jnp.float32(-1.0 / temperature)                  # symmetric

    # Hoisted out of the k-loop: fold diagonal + padding validity into exp().
    pair_ok = jnp.logical_and(
        row_l != col_l, jnp.logical_and(row_l < nv_row, col_l < nv_col))
    expb = jnp.where(pair_ok, jnp.exp(logits), 0.0)                  # [M, M]

    # ---- label distances computed in-kernel (9 components + sym flag) -----
    def pairwise_l1(c0, c1):
        acc = jnp.zeros((M, M), f32)
        for c in range(c0, c1):
            acc = acc + jnp.abs(lab[:, c:c + 1] - labT[c:c + 1, :])
        return acc

    g_l1 = pairwise_l1(0, 3)
    r_l1 = pairwise_l1(3, 6)
    t_l1 = pairwise_l1(6, 9)
    s_col = lab[:, 9:10]
    s_row = labT[9:10, :]
    both_sym = jnp.logical_and(s_col > 0.5, s_row > 0.5)
    # variant: 0 = all-symmetric group, 1 = mixed (nonSym), 2 = mug
    use_g = jnp.logical_or(var_col == 0,
                           jnp.logical_and(var_col == 2, both_sym))
    rot = jnp.where(use_g, g_l1, 0.5 * (g_l1 + r_l1))
    ld = soft_lambda * t_l1 + (1.0 - soft_lambda) * rot              # [M, M]

    # ---- extract the block diagonal into the packed [n_pad, M] layout -----
    # pack[j, lane=(p,i)] == value between sample (p,i) and sample (p,j).
    # Only static sublane slices + lane selects (no lane-offset slicing).
    ld_pack = jnp.zeros((n_pad, M), f32)
    lg_pack = jnp.zeros((n_pad, M), f32)
    eb_pack = jnp.zeros((n_pad, M), f32)
    for p in range(P):
        sl = slice(p * n_pad, (p + 1) * n_pad)
        ld_pack = jnp.where(col_in[p], ld[sl, :], ld_pack)
        lg_pack = jnp.where(col_in[p], logits[sl, :], lg_pack)
        eb_pack = jnp.where(col_in[p], expb[sl, :], eb_pack)
    ld_sc[...] = ld_pack
    lg_sc[...] = lg_pack

    nv_lane = nv_col                 # [1, M] valid count of the lane's group
    lane_l = col_l                   # [1, M] local sample index of the lane

    # ---- k-loop over positives: only up to the largest valid group size ---
    def body(k, acc):
        pos_ld = ld_sc[pl.ds(k, 1), :]                    # [1, M] = ld[i, k]
        pos_lg = lg_sc[pl.ds(k, 1), :]                    # [1, M] = logits[i, k]
        neg = jnp.where(ld_pack >= pos_ld, eb_pack, 0.0)  # masks already folded
        denom = jnp.maximum(jnp.sum(neg, axis=0, keepdims=True), 1e-30)
        log_prob = pos_lg - jnp.log(denom)
        valid = jnp.logical_and(
            lane_l != k, jnp.logical_and(lane_l < nv_lane, k < nv_lane))
        return acc + jnp.where(valid, -log_prob, 0.0)

    acc = lax.fori_loop(0, kmax, body, jnp.zeros((1, M), f32))

    # per-lane normalization 1/(n*(n-1)); groups with n<2 contribute 0.
    nv_f = nv_lane.astype(f32)
    wnorm = jnp.where(nv_lane >= 2,
                      1.0 / jnp.maximum(nv_f * (nv_f - 1.0), 1.0), 0.0)
    tile_loss = jnp.sum(acc * wnorm)
    out_ref[...] = jnp.full(out_ref.shape, tile_loss, jnp.float32)


# --------------------------------------------------------------------------
# Host-side grouping metadata (computed ONCE, outside the traced step)
# --------------------------------------------------------------------------
def build_group_layout(labels_np, sym_np):
    """Static grouping: which rows belong to which class and which RnC
    variant each class group uses (mug / all-symmetric / mixed)."""
    all_ids = np.unique(labels_np)
    groups = []
    for cid in all_ids:
        ind = np.where(labels_np == cid)[0].astype(np.int32)
        if int(cid) == 5:                                   # mug class
            variant = "mug"
        elif int((sym_np[ind, 0] == 0).sum()) == 0:         # all samples symmetric
            variant = "sym"
        else:                                               # some non-symmetric
            variant = "nonsym"
        groups.append((int(cid), ind, variant))
    return groups


_VARIANT_CODE = {"sym": 0, "nonsym": 1, "mug": 2}


# --------------------------------------------------------------------------
# Class_Rank.forward (traced; one pallas_call for ALL class groups)
# --------------------------------------------------------------------------
def class_rank_forward(features, gt_green, gt_red, gt_trans, sym, groups,
                       temperature=TEMPERATURE):
    G = len(groups)
    D = features.shape[1]
    max_n = max(len(ind) for _, ind, _ in groups)
    n_pad = max(8, -(-max_n // 8) * 8)                      # sublane multiple
    # Pack P groups per grid step so the anchor (lane) axis holds ~128 lanes.
    P = max(1, min(G, max(1, 128 // n_pad)))
    GS = -(-G // P)
    M = P * n_pad

    f_rows, lab_rows, nv_list, var_list = [], [], [], []
    for _, ind, variant in groups:
        n = len(ind)
        f = features[ind].astype(jnp.float32)               # static gathers
        lab = jnp.concatenate(
            [gt_green[ind].astype(jnp.float32),
             gt_red[ind].astype(jnp.float32),
             gt_trans[ind].astype(jnp.float32),
             sym[ind][:, 0:1].astype(jnp.float32)], axis=1)  # [n, 10]
        f_rows.append(jnp.pad(f, ((0, n_pad - n), (0, 0))))
        lab_rows.append(jnp.pad(lab, ((0, n_pad - n), (0, 0))))
        nv_list.append(n)
        var_list.append(_VARIANT_CODE[variant])
    # dummy group slots to fill the last super-tile (contribute exactly 0)
    for _ in range(GS * P - G):
        f_rows.append(jnp.zeros((n_pad, D), jnp.float32))
        lab_rows.append(jnp.zeros((n_pad, N_LAB), jnp.float32))
        nv_list.append(0)
        var_list.append(0)

    feats = jnp.stack(f_rows).reshape(GS, M, D)              # [GS, M, D]
    labs = jnp.stack(lab_rows).reshape(GS, M, N_LAB)         # [GS, M, 10]
    featsT = jnp.transpose(feats, (0, 2, 1))                 # [GS, D, M]
    labsT = jnp.transpose(labs, (0, 2, 1))                   # [GS, 10, M]
    nv = jnp.asarray(nv_list, jnp.int32).reshape(GS, P)
    var = jnp.asarray(var_list, jnp.int32).reshape(GS, P)

    out = pl.pallas_call(
        functools.partial(_class_rank_kernel, n_pad=n_pad, P=P,
                          temperature=float(temperature),
                          soft_lambda=SOFT_LAMBDA),
        out_shape=jax.ShapeDtypeStruct((GS, 1, 128), jnp.float32),
        grid_spec=pltpu.PrefetchScalarGridSpec(
            num_scalar_prefetch=2,
            grid=(GS,),
            in_specs=[
                pl.BlockSpec((1, M, D), lambda g, nv, var: (g, 0, 0)),
                pl.BlockSpec((1, D, M), lambda g, nv, var: (g, 0, 0)),
                pl.BlockSpec((1, M, N_LAB), lambda g, nv, var: (g, 0, 0)),
                pl.BlockSpec((1, N_LAB, M), lambda g, nv, var: (g, 0, 0)),
            ],
            out_specs=pl.BlockSpec((1, 1, 128), lambda g, nv, var: (g, 0, 0)),
            scratch_shapes=[pltpu.VMEM((n_pad, M), jnp.float32),
                            pltpu.VMEM((n_pad, M), jnp.float32)],
        ),
        compiler_params=pltpu.CompilerParams(
            dimension_semantics=("parallel",),
            vmem_limit_bytes=32 * 1024 * 1024,
        ),
    )(nv, var, feats, featsT, labs, labsT)
    return jnp.sum(out[:, 0, 0]) / jnp.float32(G)


# --------------------------------------------------------------------------
# Pure-JAX reference (for a correctness sanity check)
# --------------------------------------------------------------------------
def _pairwise_l1(x):  # [n, k] -> [n, n]
    return jnp.sum(jnp.abs(x[:, None, :] - x[None, :, :]), axis=-1)


def ldiff_trans_mix(green, trans):
    return SOFT_LAMBDA * _pairwise_l1(trans) + (1.0 - SOFT_LAMBDA) * _pairwise_l1(green)


def ldiff_nonsym_mix(green, red, trans):
    rot = 0.5 * (_pairwise_l1(green) + _pairwise_l1(red))
    return SOFT_LAMBDA * _pairwise_l1(trans) + (1.0 - SOFT_LAMBDA) * rot


def ldiff_mug_mix(green, red, trans, sym):
    g = _pairwise_l1(green)
    r = _pairwise_l1(red)
    t = _pairwise_l1(trans)
    s = (sym[:, 0] == 1)
    both_sym = jnp.logical_and(s[:, None], s[None, :])
    rot = jnp.where(both_sym, g, 0.5 * (g + r))
    return SOFT_LAMBDA * t + (1.0 - SOFT_LAMBDA) * rot


def rnc_loss_ref(features, label_diffs, temperature=TEMPERATURE):
    f = features.astype(jnp.float32)
    ld = label_diffs.astype(jnp.float32)
    n = f.shape[0]
    d2 = jnp.sum((f[:, None, :] - f[None, :, :]) ** 2, axis=-1)
    dist = jnp.sqrt(jnp.maximum(d2, 0.0))
    logits = -dist / temperature
    logits = logits - jnp.max(logits, axis=1, keepdims=True)
    exp_logits = jnp.exp(logits)
    eye = jnp.eye(n, dtype=bool)
    total = jnp.float32(0.0)
    for k in range(n):
        pos_logits = logits[:, k]
        pos_ld = ld[:, k]
        neg_mask = jnp.where(jnp.logical_and(ld >= pos_ld[:, None], ~eye), 1.0, 0.0)
        denom = jnp.sum(neg_mask * exp_logits, axis=1)
        log_prob = pos_logits - jnp.log(denom)
        valid = jnp.arange(n) != k
        total = total + jnp.sum(jnp.where(valid, -log_prob, 0.0))
    return total / jnp.float32(n * (n - 1))


def class_rank_forward_ref(features, gt_green, gt_red, gt_trans, sym, groups,
                           temperature=TEMPERATURE):
    total = jnp.float32(0.0)
    for _, ind, variant in groups:
        f = features[ind]
        g = gt_green[ind]
        r = gt_red[ind]
        t = gt_trans[ind]
        s = sym[ind]
        if variant == "mug":
            ld = ldiff_mug_mix(g, r, t, s)
        elif variant == "sym":
            ld = ldiff_trans_mix(g, t)
        else:
            ld = ldiff_nonsym_mix(g, r, t)
        if len(ind) >= 2:
            total = total + rnc_loss_ref(f, ld, temperature)
    return total / jnp.float32(len(groups))


# --------------------------------------------------------------------------
if __name__ == "__main__":
    key = jax.random.PRNGKey(0)
    k1, k2, k3, k4 = jax.random.split(key, 4)

    bs, D = 12, 32
    features = jax.random.normal(k1, (bs, D), jnp.float32)
    gt_green = jax.random.normal(k2, (bs, 3), jnp.float32)
    gt_red = jax.random.normal(k3, (bs, 3), jnp.float32)
    gt_trans = jax.random.normal(k4, (bs, 3), jnp.float32)

    # three class groups of 4: class 1 all-symmetric, class 2 mixed, class 5 = mug
    labels_np = np.array([1, 1, 1, 1, 2, 2, 2, 2, 5, 5, 5, 5], np.int32)
    sym_np = np.array([[1], [1], [1], [1],
                       [0], [1], [0], [1],
                       [1], [0], [1], [0]], np.int32)
    sym = jnp.asarray(sym_np)

    # grouping metadata computed once on host (no per-step device->host sync)
    groups = build_group_layout(labels_np, sym_np)

    fwd = jax.jit(lambda f, g, r, t, s: class_rank_forward(f, g, r, t, s, groups))
    loss = jax.block_until_ready(fwd(features, gt_green, gt_red, gt_trans, sym))

    loss_ref = class_rank_forward_ref(features, gt_green, gt_red, gt_trans, sym, groups)
    loss_ref = jax.block_until_ready(loss_ref)

    assert np.isfinite(float(loss))
    # bf16 Gram on the MXU (f32 accumulation) -> slightly looser tolerance than
    # the all-f32 direct-difference reference.
    np.testing.assert_allclose(float(loss), float(loss_ref), rtol=2e-2, atol=2e-2)
    print("KERNEL_OK")
</pallas_src>

<mosaic_0001>
module attributes {stable_mosaic.version = 11 : i64} {
  func.func @_class_rank_kernel(%arg0: i32, %arg1: memref<1x3xi32, #tpu.memory_space<smem>>, %arg2: memref<1x3xi32, #tpu.memory_space<smem>>, %arg3: memref<1x24x32xf32, #tpu.memory_space<vmem>>, %arg4: memref<1x32x24xf32, #tpu.memory_space<vmem>>, %arg5: memref<1x24x10xf32, #tpu.memory_space<vmem>>, %arg6: memref<1x10x24xf32, #tpu.memory_space<vmem>>, %arg7: memref<1x1x128xf32, #tpu.memory_space<vmem>>, %arg8: memref<8x24xf32, #tpu.memory_space<vmem>>, %arg9: memref<8x24xf32, #tpu.memory_space<vmem>>) attributes {dimension_semantics = [#tpu.dimension_semantics<parallel>], iteration_bounds = array<i64: 1>, scalar_prefetch = 2 : i64, scratch_operands = 2 : i64, tpu.core_type = #tpu.core_type<tc>, window_params = [{transform_indices = @transform_0, window_bounds = array<i64: 1, 24, 32>}, {transform_indices = @transform_1, window_bounds = array<i64: 1, 32, 24>}, {transform_indices = @transform_2, window_bounds = array<i64: 1, 24, 10>}, {transform_indices = @transform_3, window_bounds = array<i64: 1, 10, 24>}, {transform_indices = @transform_4, window_bounds = array<i64: 1, 1, 128>}]} {
    %c0 = arith.constant 0 : index
    %c0_0 = arith.constant 0 : index
    %c0_1 = arith.constant 0 : index
    %0 = vector.load %arg3[%c0, %c0_0, %c0_1] : memref<1x24x32xf32, #tpu.memory_space<vmem>>, vector<1x24x32xf32>
    %1 = vector.shape_cast %0 : vector<1x24x32xf32> to vector<24x32xf32>
    %c0_2 = arith.constant 0 : index
    %c0_3 = arith.constant 0 : index
    %c0_4 = arith.constant 0 : index
    %2 = vector.load %arg4[%c0_2, %c0_3, %c0_4] : memref<1x32x24xf32, #tpu.memory_space<vmem>>, vector<1x32x24xf32>
    %3 = vector.shape_cast %2 : vector<1x32x24xf32> to vector<32x24xf32>
    %c0_5 = arith.constant 0 : index
    %c0_6 = arith.constant 0 : index
    %c0_7 = arith.constant 0 : index
    %4 = vector.load %arg5[%c0_5, %c0_6, %c0_7] : memref<1x24x10xf32, #tpu.memory_space<vmem>>, vector<1x24x10xf32>
    %5 = vector.shape_cast %4 : vector<1x24x10xf32> to vector<24x10xf32>
    %c0_8 = arith.constant 0 : index
    %c0_9 = arith.constant 0 : index
    %c0_10 = arith.constant 0 : index
    %6 = vector.load %arg6[%c0_8, %c0_9, %c0_10] : memref<1x10x24xf32, #tpu.memory_space<vmem>>, vector<1x10x24xf32>
    %7 = vector.shape_cast %6 : vector<1x10x24xf32> to vector<10x24xf32>
    %8 = tpu.iota {dimensions = array<i32: 0>} : vector<24x1xi32>
    %9 = tpu.iota {dimensions = array<i32: 1>} : vector<1x24xi32>
    %c0_i32 = arith.constant 0 : i32
    %10 = vector.broadcast %c0_i32 : i32 to vector<1x24xi32>
    %c0_i32_11 = arith.constant 0 : i32
    %11 = vector.broadcast %c0_i32_11 : i32 to vector<24x1xi32>
    %c0_i32_12 = arith.constant 0 : i32
    %12 = vector.broadcast %c0_i32_12 : i32 to vector<1x24xi32>
    %13 = arith.index_cast %arg0 : i32 to index
    %c0_13 = arith.constant 0 : index
    %14 = memref.load %arg1[%13, %c0_13] : memref<1x3xi32, #tpu.memory_space<smem>>
    %15 = arith.index_cast %arg0 : i32 to index
    %c0_14 = arith.constant 0 : index
    %16 = memref.load %arg2[%15, %c0_14] : memref<1x3xi32, #tpu.memory_space<smem>>
    %c0_i32_15 = arith.constant 0 : i32
    %17 = vector.broadcast %c0_i32_15 : i32 to vector<1x24xi32>
    %18 = arith.cmpi sge, %9, %17 : vector<1x24xi32>
    %c8_i32 = arith.constant 8 : i32
    %19 = vector.broadcast %c8_i32 : i32 to vector<1x24xi32>
    %20 = arith.cmpi slt, %9, %19 : vector<1x24xi32>
    %21 = arith.andi %18, %20 : vector<1x24xi1>
    %c0_i32_16 = arith.constant 0 : i32
    %22 = vector.broadcast %c0_i32_16 : i32 to vector<24x1xi32>
    %23 = arith.cmpi sge, %8, %22 : vector<24x1xi32>
    %c8_i32_17 = arith.constant 8 : i32
    %24 = vector.broadcast %c8_i32_17 : i32 to vector<24x1xi32>
    %25 = arith.cmpi slt, %8, %24 : vector<24x1xi32>
    %26 = arith.andi %23, %25 : vector<24x1xi1>
    %27 = vector.broadcast %14 : i32 to vector<1x24xi32>
    %28 = arith.select %21, %27, %10 : vector<1x24xi1>, vector<1x24xi32>
    %29 = vector.broadcast %14 : i32 to vector<24x1xi32>
    %30 = arith.select %26, %29, %11 : vector<24x1xi1>, vector<24x1xi32>
    %31 = vector.broadcast %16 : i32 to vector<1x24xi32>
    %32 = arith.select %21, %31, %12 : vector<1x24xi1>, vector<1x24xi32>
    %c0_i32_18 = arith.constant 0 : i32
    %33 = vector.broadcast %c0_i32_18 : i32 to vector<1x24xi32>
    %34 = arith.subi %9, %33 : vector<1x24xi32>
    %35 = arith.select %21, %34, %9 : vector<1x24xi1>, vector<1x24xi32>
    %c0_i32_19 = arith.constant 0 : i32
    %36 = vector.broadcast %c0_i32_19 : i32 to vector<24x1xi32>
    %37 = arith.subi %8, %36 : vector<24x1xi32>
    %38 = arith.select %26, %37, %8 : vector<24x1xi1>, vector<24x1xi32>
    %c0_i32_20 = arith.constant 0 : i32
    %39 = arith.maxsi %c0_i32_20, %14 : i32
    %40 = arith.index_cast %arg0 : i32 to index
    %c1 = arith.constant 1 : index
    %41 = memref.load %arg1[%40, %c1] : memref<1x3xi32, #tpu.memory_space<smem>>
    %42 = arith.index_cast %arg0 : i32 to index
    %c1_21 = arith.constant 1 : index
    %43 = memref.load %arg2[%42, %c1_21] : memref<1x3xi32, #tpu.memory_space<smem>>
    %c8_i32_22 = arith.constant 8 : i32
    %44 = vector.broadcast %c8_i32_22 : i32 to vector<1x24xi32>
    %45 = arith.cmpi sge, %9, %44 : vector<1x24xi32>
    %c16_i32 = arith.constant 16 : i32
    %46 = vector.broadcast %c16_i32 : i32 to vector<1x24xi32>
    %47 = arith.cmpi slt, %9, %46 : vector<1x24xi32>
    %48 = arith.andi %45, %47 : vector<1x24xi1>
    %c8_i32_23 = arith.constant 8 : i32
    %49 = vector.broadcast %c8_i32_23 : i32 to vector<24x1xi32>
    %50 = arith.cmpi sge, %8, %49 : vector<24x1xi32>
    %c16_i32_24 = arith.constant 16 : i32
    %51 = vector.broadcast %c16_i32_24 : i32 to vector<24x1xi32>
    %52 = arith.cmpi slt, %8, %51 : vector<24x1xi32>
    %53 = arith.andi %50, %52 : vector<24x1xi1>
    %54 = vector.broadcast %41 : i32 to vector<1x24xi32>
    %55 = arith.select %48, %54, %28 : vector<1x24xi1>, vector<1x24xi32>
    %56 = vector.broadcast %41 : i32 to vector<24x1xi32>
    %57 = arith.select %53, %56, %30 : vector<24x1xi1>, vector<24x1xi32>
    %58 = vector.broadcast %43 : i32 to vector<1x24xi32>
    %59 = arith.select %48, %58, %32 : vector<1x24xi1>, vector<1x24xi32>
    %c8_i32_25 = arith.constant 8 : i32
    %60 = vector.broadcast %c8_i32_25 : i32 to vector<1x24xi32>
    %61 = arith.subi %9, %60 : vector<1x24xi32>
    %62 = arith.select %48, %61, %35 : vector<1x24xi1>, vector<1x24xi32>
    %c8_i32_26 = arith.constant 8 : i32
    %63 = vector.broadcast %c8_i32_26 : i32 to vector<24x1xi32>
    %64 = arith.subi %8, %63 : vector<24x1xi32>
    %65 = arith.select %53, %64, %38 : vector<24x1xi1>, vector<24x1xi32>
    %66 = arith.maxsi %39, %41 : i32
    %67 = arith.index_cast %arg0 : i32 to index
    %c2 = arith.constant 2 : index
    %68 = memref.load %arg1[%67, %c2] : memref<1x3xi32, #tpu.memory_space<smem>>
    %69 = arith.index_cast %arg0 : i32 to index
    %c2_27 = arith.constant 2 : index
    %70 = memref.load %arg2[%69, %c2_27] : memref<1x3xi32, #tpu.memory_space<smem>>
    %c16_i32_28 = arith.constant 16 : i32
    %71 = vector.broadcast %c16_i32_28 : i32 to vector<1x24xi32>
    %72 = arith.cmpi sge, %9, %71 : vector<1x24xi32>
    %c24_i32 = arith.constant 24 : i32
    %73 = vector.broadcast %c24_i32 : i32 to vector<1x24xi32>
    %74 = arith.cmpi slt, %9, %73 : vector<1x24xi32>
    %75 = arith.andi %72, %74 : vector<1x24xi1>
    %c16_i32_29 = arith.constant 16 : i32
    %76 = vector.broadcast %c16_i32_29 : i32 to vector<24x1xi32>
    %77 = arith.cmpi sge, %8, %76 : vector<24x1xi32>
    %c24_i32_30 = arith.constant 24 : i32
    %78 = vector.broadcast %c24_i32_30 : i32 to vector<24x1xi32>
    %79 = arith.cmpi slt, %8, %78 : vector<24x1xi32>
    %80 = arith.andi %77, %79 : vector<24x1xi1>
    %81 = vector.broadcast %68 : i32 to vector<1x24xi32>
    %82 = arith.select %75, %81, %55 : vector<1x24xi1>, vector<1x24xi32>
    %83 = vector.broadcast %68 : i32 to vector<24x1xi32>
    %84 = arith.select %80, %83, %57 : vector<24x1xi1>, vector<24x1xi32>
    %85 = vector.broadcast %70 : i32 to vector<1x24xi32>
    %86 = arith.select %75, %85, %59 : vector<1x24xi1>, vector<1x24xi32>
    %c16_i32_31 = arith.constant 16 : i32
    %87 = vector.broadcast %c16_i32_31 : i32 to vector<1x24xi32>
    %88 = arith.subi %9, %87 : vector<1x24xi32>
    %89 = arith.select %75, %88, %62 : vector<1x24xi1>, vector<1x24xi32>
    %c16_i32_32 = arith.constant 16 : i32
    %90 = vector.broadcast %c16_i32_32 : i32 to vector<24x1xi32>
    %91 = arith.subi %8, %90 : vector<24x1xi32>
    %92 = arith.select %80, %91, %65 : vector<24x1xi1>, vector<24x1xi32>
    %93 = arith.maxsi %66, %68 : i32
    %94 = arith.truncf %1 : vector<24x32xf32> to vector<24x32xbf16>
    %95 = arith.truncf %3 : vector<32x24xf32> to vector<32x24xbf16>
    %cst = arith.constant dense<0.000000e+00> : vector<24x24xf32>
    %96 = tpu.matmul %94, %95, %cst {dimension_numbers = #tpu.dot_dimension_numbers<[1], [0], [0], [1], [0, 0, 1, 1], [], []>} : vector<24x32xbf16>, vector<32x24xbf16>, vector<24x24xf32> -> vector<24x24xf32>
    %97 = arith.mulf %1, %1 : vector<24x32xf32>
    %cst_33 = arith.constant dense<0.000000e+00> : vector<24xf32>
    %98 = vector.multi_reduction <add>, %97, %cst_33 [1] : vector<24x32xf32> to vector<24xf32>
    %99 = vector.shape_cast %98 : vector<24xf32> to vector<24x1xf32>
    %100 = arith.mulf %3, %3 : vector<32x24xf32>
    %cst_34 = arith.constant dense<0.000000e+00> : vector<24xf32>
    %101 = vector.multi_reduction <add>, %100, %cst_34 [0] : vector<32x24xf32> to vector<24xf32>
    %102 = vector.shape_cast %101 : vector<24xf32> to vector<1x24xf32>
    %103 = vector.broadcast %99 : vector<24x1xf32> to vector<24x24xf32>
    %104 = vector.broadcast %102 : vector<1x24xf32> to vector<24x24xf32>
    %105 = arith.addf %103, %104 : vector<24x24xf32>
    %cst_35 = arith.constant 2.000000e+00 : f32
    %106 = vector.broadcast %cst_35 : f32 to vector<24x24xf32>
    %107 = arith.mulf %106, %96 : vector<24x24xf32>
    %108 = arith.subf %105, %107 : vector<24x24xf32>
    %cst_36 = arith.constant 0.000000e+00 : f32
    %109 = vector.broadcast %cst_36 : f32 to vector<24x24xf32>
    %110 = arith.maximumf %108, %109 : vector<24x24xf32>
    %111 = math.sqrt %110 : vector<24x24xf32>
    %cst_37 = arith.constant -5.000000e-01 : f32
    %112 = vector.broadcast %cst_37 : f32 to vector<24x24xf32>
    %113 = arith.mulf %111, %112 : vector<24x24xf32>
    %114 = vector.broadcast %92 : vector<24x1xi32> to vector<24x24xi32>
    %115 = vector.broadcast %89 : vector<1x24xi32> to vector<24x24xi32>
    %116 = arith.cmpi ne, %114, %115 : vector<24x24xi32>
    %117 = arith.cmpi slt, %92, %84 : vector<24x1xi32>
    %118 = arith.cmpi slt, %89, %82 : vector<1x24xi32>
    %119 = vector.broadcast %117 : vector<24x1xi1> to vector<24x24xi1>
    %120 = vector.broadcast %118 : vector<1x24xi1> to vector<24x24xi1>
    %121 = arith.andi %119, %120 : vector<24x24xi1>
    %122 = arith.andi %116, %121 : vector<24x24xi1>
    %123 = math.exp %113 : vector<24x24xf32>
    %cst_38 = arith.constant 0.000000e+00 : f32
    %124 = vector.broadcast %cst_38 : f32 to vector<24x24xf32>
    %125 = arith.select %122, %123, %124 : vector<24x24xi1>, vector<24x24xf32>
    %cst_39 = arith.constant 0.000000e+00 : f32
    %126 = vector.broadcast %cst_39 : f32 to vector<24x24xf32>
    %127 = vector.extract_strided_slice %5 {offsets = [0, 0], sizes = [24, 1], strides = [1, 1]} : vector<24x10xf32> to vector<24x1xf32>
    %128 = vector.extract_strided_slice %7 {offsets = [0, 0], sizes = [1, 24], strides = [1, 1]} : vector<10x24xf32> to vector<1x24xf32>
    %129 = vector.broadcast %127 : vector<24x1xf32> to vector<24x24xf32>
    %130 = vector.broadcast %128 : vector<1x24xf32> to vector<24x24xf32>
    %131 = arith.subf %129, %130 : vector<24x24xf32>
    %132 = math.absf %131 : vector<24x24xf32>
    %133 = arith.addf %126, %132 : vector<24x24xf32>
    %134 = vector.extract_strided_slice %5 {offsets = [0, 1], sizes = [24, 1], strides = [1, 1]} : vector<24x10xf32> to vector<24x1xf32>
    %135 = vector.extract_strided_slice %7 {offsets = [1, 0], sizes = [1, 24], strides = [1, 1]} : vector<10x24xf32> to vector<1x24xf32>
    %136 = vector.broadcast %134 : vector<24x1xf32> to vector<24x24xf32>
    %137 = vector.broadcast %135 : vector<1x24xf32> to vector<24x24xf32>
    %138 = arith.subf %136, %137 : vector<24x24xf32>
    %139 = math.absf %138 : vector<24x24xf32>
    %140 = arith.addf %133, %139 : vector<24x24xf32>
    %141 = vector.extract_strided_slice %5 {offsets = [0, 2], sizes = [24, 1], strides = [1, 1]} : vector<24x10xf32> to vector<24x1xf32>
    %142 = vector.extract_strided_slice %7 {offsets = [2, 0], sizes = [1, 24], strides = [1, 1]} : vector<10x24xf32> to vector<1x24xf32>
    %143 = vector.broadcast %141 : vector<24x1xf32> to vector<24x24xf32>
    %144 = vector.broadcast %142 : vector<1x24xf32> to vector<24x24xf32>
    %145 = arith.subf %143, %144 : vector<24x24xf32>
    %146 = math.absf %145 : vector<24x24xf32>
    %147 = arith.addf %140, %146 : vector<24x24xf32>
    %cst_40 = arith.constant 0.000000e+00 : f32
    %148 = vector.broadcast %cst_40 : f32 to vector<24x24xf32>
    %149 = vector.extract_strided_slice %5 {offsets = [0, 3], sizes = [24, 1], strides = [1, 1]} : vector<24x10xf32> to vector<24x1xf32>
    %150 = vector.extract_strided_slice %7 {offsets = [3, 0], sizes = [1, 24], strides = [1, 1]} : vector<10x24xf32> to vector<1x24xf32>
    %151 = vector.broadcast %149 : vector<24x1xf32> to vector<24x24xf32>
    %152 = vector.broadcast %150 : vector<1x24xf32> to vector<24x24xf32>
    %153 = arith.subf %151, %152 : vector<24x24xf32>
    %154 = math.absf %153 : vector<24x24xf32>
    %155 = arith.addf %148, %154 : vector<24x24xf32>
    %156 = vector.extract_strided_slice %5 {offsets = [0, 4], sizes = [24, 1], strides = [1, 1]} : vector<24x10xf32> to vector<24x1xf32>
    %157 = vector.extract_strided_slice %7 {offsets = [4, 0], sizes = [1, 24], strides = [1, 1]} : vector<10x24xf32> to vector<1x24xf32>
    %158 = vector.broadcast %156 : vector<24x1xf32> to vector<24x24xf32>
    %159 = vector.broadcast %157 : vector<1x24xf32> to vector<24x24xf32>
    %160 = arith.subf %158, %159 : vector<24x24xf32>
    %161 = math.absf %160 : vector<24x24xf32>
    %162 = arith.addf %155, %161 : vector<24x24xf32>
    %163 = vector.extract_strided_slice %5 {offsets = [0, 5], sizes = [24, 1], strides = [1, 1]} : vector<24x10xf32> to vector<24x1xf32>
    %164 = vector.extract_strided_slice %7 {offsets = [5, 0], sizes = [1, 24], strides = [1, 1]} : vector<10x24xf32> to vector<1x24xf32>
    %165 = vector.broadcast %163 : vector<24x1xf32> to vector<24x24xf32>
    %166 = vector.broadcast %164 : vector<1x24xf32> to vector<24x24xf32>
    %167 = arith.subf %165, %166 : vector<24x24xf32>
    %168 = math.absf %167 : vector<24x24xf32>
    %169 = arith.addf %162, %168 : vector<24x24xf32>
    %cst_41 = arith.constant 0.000000e+00 : f32
    %170 = vector.broadcast %cst_41 : f32 to vector<24x24xf32>
    %171 = vector.extract_strided_slice %5 {offsets = [0, 6], sizes = [24, 1], strides = [1, 1]} : vector<24x10xf32> to vector<24x1xf32>
    %172 = vector.extract_strided_slice %7 {offsets = [6, 0], sizes = [1, 24], strides = [1, 1]} : vector<10x24xf32> to vector<1x24xf32>
    %173 = vector.broadcast %171 : vector<24x1xf32> to vector<24x24xf32>
    %174 = vector.broadcast %172 : vector<1x24xf32> to vector<24x24xf32>
    %175 = arith.subf %173, %174 : vector<24x24xf32>
    %176 = math.absf %175 : vector<24x24xf32>
    %177 = arith.addf %170, %176 : vector<24x24xf32>
    %178 = vector.extract_strided_slice %5 {offsets = [0, 7], sizes = [24, 1], strides = [1, 1]} : vector<24x10xf32> to vector<24x1xf32>
    %179 = vector.extract_strided_slice %7 {offsets = [7, 0], sizes = [1, 24], strides = [1, 1]} : vector<10x24xf32> to vector<1x24xf32>
    %180 = vector.broadcast %178 : vector<24x1xf32> to vector<24x24xf32>
    %181 = vector.broadcast %179 : vector<1x24xf32> to vector<24x24xf32>
    %182 = arith.subf %180, %181 : vector<24x24xf32>
    %183 = math.absf %182 : vector<24x24xf32>
    %184 = arith.addf %177, %183 : vector<24x24xf32>
    %185 = vector.extract_strided_slice %5 {offsets = [0, 8], sizes = [24, 1], strides = [1, 1]} : vector<24x10xf32> to vector<24x1xf32>
    %186 = vector.extract_strided_slice %7 {offsets = [8, 0], sizes = [1, 24], strides = [1, 1]} : vector<10x24xf32> to vector<1x24xf32>
    %187 = vector.broadcast %185 : vector<24x1xf32> to vector<24x24xf32>
    %188 = vector.broadcast %186 : vector<1x24xf32> to vector<24x24xf32>
    %189 = arith.subf %187, %188 : vector<24x24xf32>
    %190 = math.absf %189 : vector<24x24xf32>
    %191 = arith.addf %184, %190 : vector<24x24xf32>
    %192 = vector.extract_strided_slice %5 {offsets = [0, 9], sizes = [24, 1], strides = [1, 1]} : vector<24x10xf32> to vector<24x1xf32>
    %193 = vector.extract_strided_slice %7 {offsets = [9, 0], sizes = [1, 24], strides = [1, 1]} : vector<10x24xf32> to vector<1x24xf32>
    %cst_42 = arith.constant 5.000000e-01 : f32
    %194 = vector.broadcast %cst_42 : f32 to vector<24x1xf32>
    %195 = arith.cmpf ogt, %192, %194 : vector<24x1xf32>
    %cst_43 = arith.constant 5.000000e-01 : f32
    %196 = vector.broadcast %cst_43 : f32 to vector<1x24xf32>
    %197 = arith.cmpf ogt, %193, %196 : vector<1x24xf32>
    %198 = vector.broadcast %195 : vector<24x1xi1> to vector<24x24xi1>
    %199 = vector.broadcast %197 : vector<1x24xi1> to vector<24x24xi1>
    %200 = arith.andi %198, %199 : vector<24x24xi1>
    %c0_i32_44 = arith.constant 0 : i32
    %201 = vector.broadcast %c0_i32_44 : i32 to vector<1x24xi32>
    %202 = arith.cmpi eq, %86, %201 : vector<1x24xi32>
    %c2_i32 = arith.constant 2 : i32
    %203 = vector.broadcast %c2_i32 : i32 to vector<1x24xi32>
    %204 = arith.cmpi eq, %86, %203 : vector<1x24xi32>
    %205 = vector.broadcast %204 : vector<1x24xi1> to vector<24x24xi1>
    %206 = arith.andi %205, %200 : vector<24x24xi1>
    %207 = vector.broadcast %202 : vector<1x24xi1> to vector<24x24xi1>
    %208 = arith.ori %207, %206 : vector<24x24xi1>
    %209 = arith.addf %147, %169 : vector<24x24xf32>
    %cst_45 = arith.constant 5.000000e-01 : f32
    %210 = vector.broadcast %cst_45 : f32 to vector<24x24xf32>
    %211 = arith.mulf %210, %209 : vector<24x24xf32>
    %212 = arith.select %208, %147, %211 : vector<24x24xi1>, vector<24x24xf32>
    %cst_46 = arith.constant 8.000000e-01 : f32
    %213 = vector.broadcast %cst_46 : f32 to vector<24x24xf32>
    %214 = arith.mulf %213, %191 : vector<24x24xf32>
    %cst_47 = arith.constant 2.000000e-01 : f32
    %215 = vector.broadcast %cst_47 : f32 to vector<24x24xf32>
    %216 = arith.mulf %215, %212 : vector<24x24xf32>
    %217 = arith.addf %214, %216 : vector<24x24xf32>
    %cst_48 = arith.constant 0.000000e+00 : f32
    %218 = vector.broadcast %cst_48 : f32 to vector<8x24xf32>
    %cst_49 = arith.constant 0.000000e+00 : f32
    %219 = vector.broadcast %cst_49 : f32 to vector<8x24xf32>
    %cst_50 = arith.constant 0.000000e+00 : f32
    %220 = vector.broadcast %cst_50 : f32 to vector<8x24xf32>
    %221 = vector.extract_strided_slice %217 {offsets = [0, 0], sizes = [8, 24], strides = [1, 1]} : vector<24x24xf32> to vector<8x24xf32>
    %222 = vector.shape_cast %21 : vector<1x24xi1> to vector<1x24xi1>
    %223 = vector.broadcast %222 : vector<1x24xi1> to vector<8x24xi1>
    %224 = arith.select %223, %221, %218 : vector<8x24xi1>, vector<8x24xf32>
    %225 = vector.extract_strided_slice %113 {offsets = [0, 0], sizes = [8, 24], strides = [1, 1]} : vector<24x24xf32> to vector<8x24xf32>
    %226 = vector.shape_cast %21 : vector<1x24xi1> to vector<1x24xi1>
    %227 = vector.broadcast %226 : vector<1x24xi1> to vector<8x24xi1>
    %228 = arith.select %227, %225, %219 : vector<8x24xi1>, vector<8x24xf32>
    %229 = vector.extract_strided_slice %125 {offsets = [0, 0], sizes = [8, 24], strides = [1, 1]} : vector<24x24xf32> to vector<8x24xf32>
    %230 = vector.shape_cast %21 : vector<1x24xi1> to vector<1x24xi1>
    %231 = vector.broadcast %230 : vector<1x24xi1> to vector<8x24xi1>
    %232 = arith.select %231, %229, %220 : vector<8x24xi1>, vector<8x24xf32>
    %233 = vector.extract_strided_slice %217 {offsets = [8, 0], sizes = [8, 24], strides = [1, 1]} : vector<24x24xf32> to vector<8x24xf32>
    %234 = vector.shape_cast %48 : vector<1x24xi1> to vector<1x24xi1>
    %235 = vector.broadcast %234 : vector<1x24xi1> to vector<8x24xi1>
    %236 = arith.select %235, %233, %224 : vector<8x24xi1>, vector<8x24xf32>
    %237 = vector.extract_strided_slice %113 {offsets = [8, 0], sizes = [8, 24], strides = [1, 1]} : vector<24x24xf32> to vector<8x24xf32>
    %238 = vector.shape_cast %48 : vector<1x24xi1> to vector<1x24xi1>
    %239 = vector.broadcast %238 : vector<1x24xi1> to vector<8x24xi1>
    %240 = arith.select %239, %237, %228 : vector<8x24xi1>, vector<8x24xf32>
    %241 = vector.extract_strided_slice %125 {offsets = [8, 0], sizes = [8, 24], strides = [1, 1]} : vector<24x24xf32> to vector<8x24xf32>
    %242 = vector.shape_cast %48 : vector<1x24xi1> to vector<1x24xi1>
    %243 = vector.broadcast %242 : vector<1x24xi1> to vector<8x24xi1>
    %244 = arith.select %243, %241, %232 : vector<8x24xi1>, vector<8x24xf32>
    %245 = vector.extract_strided_slice %217 {offsets = [16, 0], sizes = [8, 24], strides = [1, 1]} : vector<24x24xf32> to vector<8x24xf32>
    %246 = vector.shape_cast %75 : vector<1x24xi1> to vector<1x24xi1>
    %247 = vector.broadcast %246 : vector<1x24xi1> to vector<8x24xi1>
    %248 = arith.select %247, %245, %236 : vector<8x24xi1>, vector<8x24xf32>
    %249 = vector.extract_strided_slice %113 {offsets = [16, 0], sizes = [8, 24], strides = [1, 1]} : vector<24x24xf32> to vector<8x24xf32>
    %250 = vector.shape_cast %75 : vector<1x24xi1> to vector<1x24xi1>
    %251 = vector.broadcast %250 : vector<1x24xi1> to vector<8x24xi1>
    %252 = arith.select %251, %249, %240 : vector<8x24xi1>, vector<8x24xf32>
    %253 = vector.extract_strided_slice %125 {offsets = [16, 0], sizes = [8, 24], strides = [1, 1]} : vector<24x24xf32> to vector<8x24xf32>
    %254 = vector.shape_cast %75 : vector<1x24xi1> to vector<1x24xi1>
    %255 = vector.broadcast %254 : vector<1x24xi1> to vector<8x24xi1>
    %256 = arith.select %255, %253, %244 : vector<8x24xi1>, vector<8x24xf32>
    %c0_51 = arith.constant 0 : index
    %c0_52 = arith.constant 0 : index
    %257 = vector.load %arg8[%c0_51, %c0_52] : memref<8x24xf32, #tpu.memory_space<vmem>>, vector<8x24xf32>
    tpu.vector_store %arg8[%c0_51, %c0_52], %248 {strides = array<i32>} : memref<8x24xf32, #tpu.memory_space<vmem>>, vector<8x24xf32>,
    %c0_53 = arith.constant 0 : index
    %c0_54 = arith.constant 0 : index
    %258 = vector.load %arg9[%c0_53, %c0_54] : memref<8x24xf32, #tpu.memory_space<vmem>>, vector<8x24xf32>
    tpu.vector_store %arg9[%c0_53, %c0_54], %252 {strides = array<i32>} : memref<8x24xf32, #tpu.memory_space<vmem>>, vector<8x24xf32>,
    %cst_55 = arith.constant 0.000000e+00 : f32
    %259 = vector.broadcast %cst_55 : f32 to vector<1x24xf32>
    %c0_i32_56 = arith.constant 0 : i32
    %260 = arith.subi %93, %c0_i32_56 : i32
    %261 = arith.addi %c0_i32_56, %260 : i32
    %c1_i32 = arith.constant 1 : i32
    %262 = scf.for %arg10 = %c0_i32_56 to %261 step %c1_i32 iter_args(%arg11 = %259) -> (vector<1x24xf32>)  : i32 {
      %282 = arith.index_cast %arg10 : i32 to index
      %c0_66 = arith.constant 0 : index
      %283 = vector.load %arg8[%282, %c0_66] : memref<8x24xf32, #tpu.memory_space<vmem>>, vector<1x24xf32>
      %284 = arith.index_cast %arg10 : i32 to index
      %c0_67 = arith.constant 0 : index
      %285 = vector.load %arg9[%284, %c0_67] : memref<8x24xf32, #tpu.memory_space<vmem>>, vector<1x24xf32>
      %286 = vector.broadcast %283 : vector<1x24xf32> to vector<8x24xf32>
      %287 = arith.cmpf oge, %248, %286 : vector<8x24xf32>
      %cst_68 = arith.constant 0.000000e+00 : f32
      %288 = vector.broadcast %cst_68 : f32 to vector<8x24xf32>
      %289 = arith.select %287, %256, %288 : vector<8x24xi1>, vector<8x24xf32>
      %cst_69 = arith.constant dense<0.000000e+00> : vector<24xf32>
      %290 = vector.multi_reduction <add>, %289, %cst_69 [0] : vector<8x24xf32> to vector<24xf32>
      %291 = vector.shape_cast %290 : vector<24xf32> to vector<1x24xf32>
      %cst_70 = arith.constant 1.000000e-30 : f32
      %292 = vector.broadcast %cst_70 : f32 to vector<1x24xf32>
      %293 = arith.maximumf %291, %292 : vector<1x24xf32>
      %294 = math.log %293 : vector<1x24xf32>
      %295 = arith.subf %285, %294 : vector<1x24xf32>
      %296 = vector.broadcast %arg10 : i32 to vector<1x24xi32>
      %297 = arith.cmpi ne, %89, %296 : vector<1x24xi32>
      %298 = arith.cmpi slt, %89, %82 : vector<1x24xi32>
      %299 = vector.broadcast %arg10 : i32 to vector<1x24xi32>
      %300 = arith.cmpi slt, %299, %82 : vector<1x24xi32>
      %301 = arith.andi %298, %300 : vector<1x24xi1>
      %302 = arith.andi %297, %301 : vector<1x24xi1>
      %cst_71 = arith.constant 0.000000e+00 : f32
      %303 = vector.broadcast %cst_71 : f32 to vector<1x24xf32>
      %304 = arith.subf %303, %295 : vector<1x24xf32>
      %cst_72 = arith.constant 0.000000e+00 : f32
      %305 = vector.broadcast %cst_72 : f32 to vector<1x24xf32>
      %306 = arith.select %302, %304, %305 : vector<1x24xi1>, vector<1x24xf32>
      %307 = arith.addf %arg11, %306 : vector<1x24xf32>
      scf.yield %307 : vector<1x24xf32>
    }
    %263 = arith.sitofp %82 : vector<1x24xi32> to vector<1x24xf32>
    %c2_i32_57 = arith.constant 2 : i32
    %264 = vector.broadcast %c2_i32_57 : i32 to vector<1x24xi32>
    %265 = arith.cmpi sge, %82, %264 : vector<1x24xi32>
    %cst_58 = arith.constant 1.000000e+00 : f32
    %266 = vector.broadcast %cst_58 : f32 to vector<1x24xf32>
    %267 = arith.subf %263, %266 : vector<1x24xf32>
    %268 = arith.mulf %263, %267 : vector<1x24xf32>
    %cst_59 = arith.constant 1.000000e+00 : f32
    %269 = vector.broadcast %cst_59 : f32 to vector<1x24xf32>
    %270 = arith.maximumf %268, %269 : vector<1x24xf32>
    %cst_60 = arith.constant 1.000000e+00 : f32
    %271 = vector.broadcast %cst_60 : f32 to vector<1x24xf32>
    %272 = arith.divf %271, %270 : vector<1x24xf32>
    %cst_61 = arith.constant 0.000000e+00 : f32
    %273 = vector.broadcast %cst_61 : f32 to vector<1x24xf32>
    %274 = arith.select %265, %272, %273 : vector<1x24xi1>, vector<1x24xf32>
    %275 = arith.mulf %262, %274 : vector<1x24xf32>
    %276 = vector.shape_cast %275 : vector<1x24xf32> to vector<1x1x24xf32>
    %cst_62 = arith.constant dense<0.000000e+00> : vector<1xf32>
    %277 = vector.multi_reduction <add>, %276, %cst_62 [1, 2] : vector<1x1x24xf32> to vector<1xf32>
    %278 = vector.shape_cast %277 : vector<1xf32> to vector<1x1x1xf32>
    %279 = vector.extract %278[0, 0, 0] : f32 from vector<1x1x1xf32>
    %280 = vector.broadcast %279 : f32 to vector<1x1x128xf32>
    %c0_63 = arith.constant 0 : index
    %c0_64 = arith.constant 0 : index
    %c0_65 = arith.constant 0 : index
    %281 = vector.load %arg7[%c0_63, %c0_64, %c0_65] : memref<1x1x128xf32, #tpu.memory_space<vmem>>, vector<1x1x128xf32>
    tpu.vector_store %arg7[%c0_63, %c0_64, %c0_65], %280 {strides = array<i32>} : memref<1x1x128xf32, #tpu.memory_space<vmem>>, vector<1x1x128xf32>,
    return
  }
  func.func @transform_0(%arg0: i32, %arg1: memref<1x3xi32, #tpu.memory_space<smem>>, %arg2: memref<1x3xi32, #tpu.memory_space<smem>>) -> (i32, i32, i32) {
    %c0_i32 = arith.constant 0 : i32
    %c0_i32_0 = arith.constant 0 : i32
    %c0_i32_1 = arith.constant 0 : i32
    return %arg0, %c0_i32, %c0_i32_0 : i32, i32, i32
  }
  func.func @transform_1(%arg0: i32, %arg1: memref<1x3xi32, #tpu.memory_space<smem>>, %arg2: memref<1x3xi32, #tpu.memory_space<smem>>) -> (i32, i32, i32) {
    %c0_i32 = arith.constant 0 : i32
    %c0_i32_0 = arith.constant 0 : i32
    %c0_i32_1 = arith.constant 0 : i32
    return %arg0, %c0_i32, %c0_i32_0 : i32, i32, i32
  }
  func.func @transform_2(%arg0: i32, %arg1: memref<1x3xi32, #tpu.memory_space<smem>>, %arg2: memref<1x3xi32, #tpu.memory_space<smem>>) -> (i32, i32, i32) {
    %c0_i32 = arith.constant 0 : i32
    %c0_i32_0 = arith.constant 0 : i32
    %c0_i32_1 = arith.constant 0 : i32
    return %arg0, %c0_i32, %c0_i32_0 : i32, i32, i32
  }
  func.func @transform_3(%arg0: i32, %arg1: memref<1x3xi32, #tpu.memory_space<smem>>, %arg2: memref<1x3xi32, #tpu.memory_space<smem>>) -> (i32, i32, i32) {
    %c0_i32 = arith.constant 0 : i32
    %c0_i32_0 = arith.constant 0 : i32
    %c0_i32_1 = arith.constant 0 : i32
    return %arg0, %c0_i32, %c0_i32_0 : i32, i32, i32
  }
  func.func @transform_4(%arg0: i32, %arg1: memref<1x3xi32, #tpu.memory_space<smem>>, %arg2: memref<1x3xi32, #tpu.memory_space<smem>>) -> (i32, i32, i32) {
    %c0_i32 = arith.constant 0 : i32
    %c0_i32_0 = arith.constant 0 : i32
    %c0_i32_1 = arith.constant 0 : i32
    return %arg0, %c0_i32, %c0_i32_0 : i32, i32, i32
  }
}

</mosaic_0001>

<bundles_post_ra>
// kernel: _lambda_.1
= control target key start
LH: loop header
LB: loop body
LE: loop exit
PB: predicated region body
PF: predicated region fallthrough
CT: control target
= control target key end

     0   :  { %s1303_s0 = inlined_call_operand.vmem [shape: s32[1,3], index: 0, kind: input, shape index: {}]   ;;  %s1304_s2 = inlined_call_operand.vmem [shape: f32[1,24,32], index: 2, kind: input, shape index: {}]   ;;  %s1305_s3 = inlined_call_operand.vmem [shape: f32[1,32,24], index: 3, kind: input, shape index: {}]   ;;  %s1306_s4 = inlined_call_operand.vmem [shape: f32[1,24,10], index: 4, kind: input, shape index: {}]   ;;  %s1307_s5 = inlined_call_operand.vmem [shape: f32[1,10,24], index: 5, kind: input, shape index: {}]   ;;  %s1308_s6 = inlined_call_operand.vmem [shape: f32[1,1,128], index: 6, kind: output, shape index: {}]   ;;  %s1309_s1 = inlined_call_operand.vmem [shape: s32[1,3], index: 1, kind: input, shape index: {}]  }
   0x1   :  { %s11_s23 = sshll.u32 %s1303_s0, 4  ;;  %s15_s26 = sshll.u32 %s1309_s1, 4  ;;  %s12_s23 = int_to_ptr.vmem [resolvable:$true] %s11_s23  ;;  %s16_s26 = int_to_ptr.vmem [resolvable:$true] %s15_s26 }
   0x2   :  { %s765_s27 = scalar_lea.vmem %s12_s23, 16  ;;  %p770_p1 = scmp.lt.s32.totalorder %s12_s23, %s12_s23 }
   0x3   :  { %p766_p0 = scmp.ne.s32.totalorder %s12_s23, %s765_s27  ;;  %p771_p2 = scmp.lt.s32.totalorder %s765_s27, %s765_s27 }
   0x5   :  { %p772_p3 = por %p771_p2, %p770_p1 }
   0x7   :  { %p773_p4 = pnand %p772_p3, %p766_p0 }
   0x9   :  { %776 = shalt.err (!%p773_p4)  }
   0xa   :  { %s815_s28 = smov [#allocation5]   ;;  %s777_s29 = scalar_lea.vmem %s16_s26, 16 }
   0xb   :  { %14 = dma.vmem_to_smem %s12_s23, 16, %s815_s28, [#allocation4] }
   0xc   :  { %p778_p5 = scmp.ne.s32.totalorder %s16_s26, %s777_s29  ;;  %p782_p6 = scmp.lt.s32.totalorder %s16_s26, %s16_s26 }
   0xd   :  { %p783_p7 = scmp.lt.s32.totalorder %s777_s29, %s777_s29 }
   0xf   :  { %p784_p8 = por %p783_p7, %p782_p6 }
  0x11   :  { %p785_p9 = pnand %p784_p8, %p778_p5 }
  0x13   :  { %788 = shalt.err (!%p785_p9)  }
  0x14   :  { %s816_s0 = smov [#allocation6]  }
  0x15   :  { %18 = dma.vmem_to_smem %s16_s26, 16, %s816_s0, [#allocation4] }
  0x16   :  { %801 = dma.done.wait [#allocation4], 32 }
  0x17   :  { %802 = vsyncadd [#allocation4], 4294967264 }
  0x18   :  { %20 = sfence }
  0x19   :  { %v33_v0 = vld [vmem:[%s1305_s3] sm:$0xff]  ;;  %v34_v1 = vld [vmem:[%s1305_s3 + $0x8] sm:$0xff]  ;;  %vm209_vm0 = vcmask 195584   ;;  %v32_v2 = vld [vmem:[%s1304_s2 + $0x10] sm:$0xff]  ;;  %vm138_vm1 = vcmask 261120   ;;  %v817_v10 = vmov 0   ;;  %v42_v49 = vlaneseq }
  0x1a   :  { %v136_v3 = vpack.c.bf16 %v34_v1, %v33_v0  ;;  %v205_v4 = vmul.f32 %v33_v0, %v33_v0  ;;  %v206_v5 = vmul.f32 %v34_v1, %v34_v1  ;;  %v195_v6 = vmul.f32 %v32_v2, %v32_v2  ;;  %v35_v7 = vld [vmem:[%s1305_s3 + $0x10] sm:$0xff]  ;;  %v36_v8 = vld [vmem:[%s1305_s3 + $0x18] sm:$0xff]  ;;  %v30_v9 = vld [vmem:[%s1304_s2] sm:$0xff]  ;;  %729 = vset.pattern.permute.xlu1 %v817_v10  ;;  %s932_s23 = sld [smem:[#allocation5 + $0x1]]  ;;  %s935_s24 = sld [smem:[#allocation5 + $0x2]] }
  0x1b   :  { %v137_v11 = vpack.c.bf16 %v36_v8, %v35_v7  ;;  %v207_v12 = vmul.f32 %v35_v7, %v35_v7  ;;  %v208_v13 = vmul.f32 %v36_v8, %v36_v8  ;;  %v31_v14 = vld [vmem:[%s1304_s2 + $0x8] sm:$0xff]  ;;  %730 = vset.pattern.permute.xlu0 %v817_v10  ;;  %v193_v21 = vmul.f32 %v30_v9, %v30_v9  ;;  %v905_v29 = vld [vmem:[%s1306_s4] sm:$0xff]  ;;  %v911_v30 = vld [vmem:[%s1306_s4 + $0x10] sm:$0xff]  ;;  %s50_s28 = sld [smem:[#allocation6]]  ;;  %s665_s29 = sld [smem:[#allocation6 + $0x1]] }
  0x1c   :  { %683 = vmatprep.subr.bf16.mxu0 %v136_v3  ;;  %v210_v15 = vsel %vm209_vm0, %v205_v4, 0.0  ;;  %v211_v16 = vsel %vm209_vm0, %v206_v5, 0.0  ;;  %v202_v17 = vsel %vm138_vm1, %v195_v6, 0.0  ;;  %v134_v18 = vpack.c.bf16 %v31_v14, %v30_v9  ;;  %v38_v32 = vld [vmem:[%s1306_s4 + $0x8] sm:$0xff]  ;;  %s929_s4 = sld [smem:[#allocation5]]  ;;  %v965_v55 = vld [vmem:[%s1307_s5] sm:$0xff] }
  0x1d   :  { %v212_v19 = vadd.f32 %v211_v16, %v210_v15  ;;  %684 = vmatpush3.bf16.msra.mxu0 %v136_v3  ;;  %203 = vadd.xlane.f32.xlu1 %v202_v17  ;;  %v213_v20 = vsel %vm209_vm0, %v207_v12, 0.0  ;;  %v215_v22 = vsel %vm209_vm0, %v208_v13, 0.0  ;;  %v194_v23 = vmul.f32 %v31_v14, %v31_v14  ;;  %s1017_s30 = sld [smem:[#allocation6 + $0x2]] }
  0x1e   :  { %685 = vmatprep.subr.bf16.mxu0 %v137_v11  ;;  %687 = vmatprep.mubr.msk.bf16.mxu0 %vm138_vm1, %v134_v18  ;;  %v196_v25 = vsel %vm138_vm1, %v193_v21, 0.0  ;;  %v135_v26 = vpack.c.bf16 %v32_v2, %v32_v2  ;;  %v818_v31 = vmov 1   ;;  %v819_v33 = vmov 4  }
  0x1f   :  { %v214_v24 = vadd.f32 %v213_v20, %v212_v19  ;;  %197 = vadd.xlane.f32.xlu0 %v196_v25  ;;  %v199_v28 = vsel %vm138_vm1, %v194_v23, 0.0  ;;  %v820_v34 = vmov 2   ;;  %v821_v35 = vmov 3  }
  0x20   :  { %v822_v36 = vmov 5   ;;  %v823_v37 = vmov 7   ;;  %v824_v38 = vmov 6   ;;  %v825_v39 = vmov 8  }
  0x21   :  { %v898_v27 = vadd.f32 %v215_v22, %v214_v24  ;;  %686 = vmatpush3.bf16.msra.mxu0 %v137_v11  ;;  %vm518_vm2 = vcmp.gt.f32.partialorder %v38_v32, 0.5  ;;  %v826_v41 = vmov 9   ;;  %vm517_vm3 = vcmp.gt.f32.partialorder %v905_v29, 0.5  ;;  %v41_v22 = vld [vmem:[%s1307_s5 + $0x8] sm:$0x3] }
  0x22   :  { %v522_v40 = vsel %vm518_vm2, 1, %v817_v10  ;;  %p70_p10 = scmp.gt.s32.totalorder %s929_s4, 0  ;;  %v521_v42 = vsel %vm517_vm3, 1, %v817_v10  ;;  %vm519_vm4 = vcmp.gt.f32.partialorder %v911_v30, 0.5  ;;  %v956_v51 = vshrl.u32 %v42_v49, 7 }
  0x23   :  { %200 = vadd.xlane.f32.xlu0 %v199_v28  ;;  %v523_v43 = vsel %vm519_vm4, 1, %v817_v10  ;;  %v217_v44 = vrot.slane %v898_v27, 4  ;;  %v1010_v20 = vand.u32 127, %v42_v49  ;;  %v68_v25 = vstv %s50_s28 }
  0x24   :  { %688 = vmatmul.mubr.msk.bf16.vlgmr.msra.gmra.mrb[0].mxu0 %vm138_vm1, %v135_v26  ;;  %s71_s25 = scalar_select %p70_p10, %s929_s4, 0  ;;  %v306_v54 = vsub.s32 0, %v956_v51  ;;  %v331_v58 = vsub.s32 1, %v956_v51  ;;  %v406_v23 = vsub.s32 4, %v956_v51  ;;  %v381_v24 = vsub.s32 3, %v956_v51 }
  0x25   :  { %v218_v45 = vadd.f32 %v217_v44, %v898_v27  ;;  %vm52_vm5 = vcmp.lt.s32.totalorder %v1010_v20, 8  ;;  %vm75_vm6 = vcmp.ge.s32.totalorder %v1010_v20, 8  ;;  %vm76_vm7 = vcmp.lt.s32.totalorder %v1010_v20, 16 }
  0x26   :  { %p101_p11 = scmp.gt.s32.totalorder %s71_s25, %s932_s23  ;;  %v970_v57 = vrot.slane %v965_v55, %v306_v54  ;;  %v977_v61 = vrot.slane %v965_v55, %v331_v58  ;;  %vm520_vm8 = vcmp.gt.f32.partialorder %v41_v22, 0.5  ;;  %v69_v27 = vsel %vm52_vm5, %v68_v25, 0  ;;  %vm1028_vm9 = vmand %vm75_vm6, %vm76_vm7 }
  0x27   :  { %v219_v46 = vrot.slane %v218_v45, 2  ;;  %vm106_vm10 = vcmp.ge.s32.totalorder %v1010_v20, 16  ;;  %vm107_vm11 = vcmp.lt.s32.totalorder %v1010_v20, 24 }
  0x28   :  { %s1325_s25 = smov (!%p101_p11, %s71_s25), %s932_s23  ;;  %vm1046_vm12 = vmand %vm106_vm10, %vm107_vm11 }
  0x29   :  { %p132_p12 = scmp.gt.s32.totalorder %s1325_s25, %s935_s24  ;;  %v220_v47 = vadd.f32 %v219_v46, %v218_v45 }
  0x2b   :  { %s1327_s25 = smov (!%p132_p12, %s1325_s25), %s935_s24  ;;  %v221_v48 = vrot.slane %v220_v47, 1 }
  0x2c   :  { %p676_p13 = scmp.le.s32.totalorder %s1327_s25, 0 }
  0x2d   :  { %v954_v50 = vadd.f32 %v221_v48, %v220_v47  ;;  %s1280_s5 = smov (!%p676_p13), 0  }
  0x2e   :  { %291 = vperm.xlu1 %729, %v905_v29  }
  0x32   :  { %301 = vperm.xlu1 %729, %v911_v30  }
  0x36   :  { %731 = vset.pattern.permute.xlu1 %v818_v31  ;;  %v382_v31 = vrot.slane %v965_v55, %v381_v24 }
  0x37   :  { %318 = vperm.xlu1 %731, %v905_v29  }
  0x39   :  { %296 = vperm.xlu0 %730, %v38_v32  }
  0x3b   :  { %322 = vperm.xlu1 %731, %v38_v32  }
  0x3d   :  { %734 = vset.pattern.permute.xlu0 %v819_v33 }
  0x3e   :  { %393 = vperm.xlu0 %734, %v905_v29  }
  0x3f   :  { %326 = vperm.xlu1 %731, %v911_v30  }
  0x42   :  { %736 = vset.pattern.permute.xlu0 %v821_v35 }
  0x43   :  { %732 = vset.pattern.permute.xlu1 %v820_v34  ;;  %376 = vperm.xlu0 %736, %v911_v30   ;;  %v536_v34 = vsel %vm520_vm8, 1, %v817_v10 }
  0x44   :  { %343 = vperm.xlu1 %732, %v905_v29  }
  0x47   :  { %738 = vset.pattern.permute.xlu0 %v822_v36 }
  0x48   :  { %347 = vperm.xlu1 %732, %v38_v32   ;;  %422 = vperm.xlu0 %738, %v38_v32  }
  0x4c   :  { %351 = vperm.xlu1 %732, %v911_v30   ;;  %740 = vset.pattern.permute.xlu0 %v823_v37 }
  0x4d   :  { %468 = vperm.xlu0 %740, %v905_v29  }
  0x50   :  { %733 = vset.pattern.permute.xlu1 %v821_v35 }
  0x51   :  { %368 = vperm.xlu1 %733, %v905_v29   ;;  %742 = vset.pattern.permute.xlu0 %v824_v38 }
  0x52   :  { %451 = vperm.xlu0 %742, %v911_v30  }
  0x55   :  { %372 = vperm.xlu1 %733, %v38_v32  }
  0x56   :  { %744 = vset.pattern.permute.xlu0 %v825_v39 }
  0x57   :  { %497 = vperm.xlu0 %744, %v38_v32  }
  0x59   :  { %735 = vset.pattern.permute.xlu1 %v819_v33 }
  0x5a   :  { %397 = vperm.xlu1 %735, %v38_v32  }
  0x5b   :  { %747 = vset.pattern.permute.xlu0 %v826_v41 }
  0x5c   :  { %528 = vperm.xlu0 %747, %v522_v40   ;;  %v123_v40 = vstv %s1017_s30 }
  0x5e   :  { %401 = vperm.xlu1 %735, %v911_v30  }
  0x62   :  { %737 = vset.pattern.permute.xlu1 %v822_v36  ;;  %v356_v36 = vsub.s32 2, %v956_v51 }
  0x63   :  { %418 = vperm.xlu1 %737, %v905_v29  }
  0x64   :  { %v1062_v47 = vrot.slane %v965_v55, %v356_v36 }
  0x67   :  { %426 = vperm.xlu1 %737, %v911_v30  }
  0x6b   :  { %739 = vset.pattern.permute.xlu1 %v824_v38 }
  0x6c   :  { %443 = vperm.xlu1 %739, %v905_v29  }
  0x70   :  { %447 = vperm.xlu1 %739, %v38_v32  }
  0x74   :  { %741 = vset.pattern.permute.xlu1 %v823_v37  ;;  %v481_v37 = vsub.s32 7, %v956_v51 }
  0x75   :  { %472 = vperm.xlu1 %741, %v38_v32   ;;  %v431_v32 = vsub.s32 5, %v956_v51 }
  0x76   :  { %v1065_v48 = vrot.slane %v965_v55, %v481_v37 }
  0x77   :  { %v1055_v10 = vrot.slane %v965_v55, %v431_v32 }
  0x79   :  { %476 = vperm.xlu1 %741, %v911_v30  }
  0x7d   :  { %743 = vset.pattern.permute.xlu1 %v825_v39 }
  0x7e   :  { %493 = vperm.xlu1 %743, %v905_v29   ;;  %v92_v29 = vstv %s665_s29 }
  0x7f   :  { %v93_v38 = vsel %vm1028_vm9, %v92_v29, %v69_v27 }
  0x80   :  { %v1069_v49 = vsel %vm1046_vm12, %v123_v40, %v93_v38 }
  0x81   :  { %vm546_vm14 = vcmp.eq.s32.totalorder %v1069_v49, 2  ;;  %vm545_vm15 = vcmp.eq.s32.totalorder %v1069_v49, 0 }
  0x82   :  { %745 = vset.pattern.permute.xlu1 %v826_v41 }
  0x83   :  { %525 = vperm.xlu1 %745, %v521_v42   ;;  %v1052_v42 = vrot.slane %v536_v34, %v331_v58 }
  0x85   :  { %vm541_vm13 = vcmp.eq.s32.totalorder %v1052_v42, 1 }
  0x87   :  { %746 = vset.pattern.permute.xlu1 %v825_v39 }
  0x88   :  { %501 = vperm.xlu1 %746, %v911_v30   ;;  %v407_v30 = vrot.slane %v965_v55, %v406_v23 }
  0x8c   :  { %748 = vset.pattern.permute.xlu1 %v826_v41  ;;  %v456_v41 = vsub.s32 6, %v956_v51 }
  0x8d   :  { %531 = vperm.xlu1 %748, %v523_v43  }
  0xaa   :  { %v204_v52 = vpop.xlane.xlu1 %203 }
  0xab   :  { %v959_v53 = vadd.f32 %v954_v50, %v204_v52 }
  0xac   :  { %v986_v5 = vpop.xlane.xlu0 %197 }
  0xae   :  { %v292_v56 = vpop.permute.xlu1 %291 }
  0xaf   :  { %v308_v60 = vsub.f32 %v292_v56, %v970_v57 }
  0xb0   :  { %v992_v8 = vpop.xlane.xlu0 %200 }
  0xb1   :  { %v311_v63 = vand.u32 2147483647, %v308_v60 }
  0xb2   :  { %v973_v59 = vpop.permute.xlu1 %301 }
  0xb3   :  { %v310_v46 = vsub.f32 %v973_v59, %v970_v57  ;;  %v1079_v59 = vrot.slane %v41_v22, %v306_v54 }
  0xb6   :  { %v319_v62 = vpop.permute.xlu1 %318 }
  0xb7   :  { %v333_v0 = vsub.f32 %v319_v62, %v977_v61 }
  0xb8   :  { %v996_v11 = vpop.permute.xlu0 %296 }
  0xb9   :  { %v336_v1 = vand.u32 2147483647, %v333_v0  ;;  %v309_v58 = vsub.f32 %v996_v11, %v970_v57 }
  0xba   :  { %v980_v2 = vpop.permute.xlu1 %322 }
  0xbb   :  { %v982_v3 = vadd.f32 %v336_v1, %v311_v63  ;;  %v334_v52 = vsub.f32 %v980_v2, %v977_v61  ;;  %v1087_v1 = vrot.slane %v965_v55, %v456_v41 }
  0xbd   :  { %v1000_v13 = vpop.permute.xlu0 %393  ;;  %v337_v55 = vand.u32 2147483647, %v334_v52 }
  0xbe   :  { %v984_v4 = vpop.permute.xlu1 %326  ;;  %v408_v62 = vsub.f32 %v1000_v13, %v407_v30  ;;  %v63_v13 = vstv %s929_s4 }
  0xbf   :  { %v335_v56 = vsub.f32 %v984_v4, %v977_v61  ;;  %v313_v4 = vand.u32 2147483647, %v310_v46 }
  0xc2   :  { %v1002_v15 = vpop.permute.xlu0 %376 }
  0xc3   :  { %v988_v6 = vpop.permute.xlu1 %343  ;;  %v385_v63 = vsub.f32 %v1002_v15, %v382_v31  ;;  %v338_v15 = vand.u32 2147483647, %v335_v56 }
  0xc4   :  { %v358_v22 = vsub.f32 %v988_v6, %v1062_v47 }
  0xc5   :  { %v388_v23 = vand.u32 2147483647, %v385_v63  ;;  %v341_v37 = vadd.f32 %v338_v15, %v313_v4 }
  0xc6   :  { %v361_v40 = vand.u32 2147483647, %v358_v22 }
  0xc7   :  { %v990_v7 = vpop.permute.xlu1 %347  ;;  %v1006_v18 = vpop.permute.xlu0 %422 }
  0xc8   :  { %v359_v57 = vsub.f32 %v990_v7, %v1062_v47  ;;  %v434_v54 = vsub.f32 %v1006_v18, %v1055_v10  ;;  %v223_v7 = vadd.f32 %v954_v50, %v986_v5  ;;  %v411_v18 = vand.u32 2147483647, %v408_v62 }
  0xca   :  { %v362_v25 = vand.u32 2147483647, %v359_v57 }
  0xcb   :  { %v994_v9 = vpop.permute.xlu1 %351 }
  0xcc   :  { %v1012_v21 = vpop.permute.xlu0 %468 }
  0xcd   :  { %v483_v4 = vsub.f32 %v1012_v21, %v1065_v48 }
  0xd0   :  { %v998_v12 = vpop.permute.xlu1 %368 }
  0xd1   :  { %v1037_v33 = vpop.permute.xlu0 %451  ;;  %v383_v0 = vsub.f32 %v998_v12, %v382_v31 }
  0xd3   :  { %v386_v24 = vand.u32 2147483647, %v383_v0 }
  0xd4   :  { %v373_v14 = vpop.permute.xlu1 %372 }
  0xd5   :  { %v384_v43 = vsub.f32 %v373_v14, %v382_v31 }
  0xd6   :  { %v1081_v60 = vpop.permute.xlu0 %497 }
  0xd7   :  { %v387_v61 = vand.u32 2147483647, %v384_v43  ;;  %v414_v43 = vadd.f32 %v411_v18, %v386_v24  ;;  %v64_v24 = vsel %vm52_vm5, %v63_v13, 0 }
  0xd9   :  { %v398_v16 = vpop.permute.xlu1 %397 }
  0xda   :  { %v409_v44 = vsub.f32 %v398_v16, %v407_v30  ;;  %v312_v16 = vand.u32 2147483647, %v309_v58 }
  0xdb   :  { %v529_v29 = vpop.permute.xlu0 %528 }
  0xdc   :  { %v412_v2 = vand.u32 2147483647, %v409_v44  ;;  %v340_v38 = vadd.f32 %v337_v55, %v312_v16  ;;  %vm534_vm1 = vcmp.eq.s32.totalorder %v529_v29, 1 }
  0xdd   :  { %v1004_v17 = vpop.permute.xlu1 %401  ;;  %vm1117_vm2 = vmand %vm534_vm1, %vm541_vm13 }
  0xde   :  { %v410_v11 = vsub.f32 %v1004_v17, %v407_v30  ;;  %v224_v17 = vadd.f32 %v954_v50, %v992_v8  ;;  %v415_v27 = vadd.f32 %v412_v2, %v387_v61  ;;  %v360_v8 = vsub.f32 %v994_v9, %v1062_v47  ;;  %vm1142_vm3 = vmand %vm546_vm14, %vm1117_vm2 }
  0xdf   :  { %v1111_v52 = vadd.f32 %v362_v25, %v340_v38  ;;  %v1159_v25 = vadd.s32 4294967288, %v1010_v20  ;;  %vm1165_vm4 = vmor %vm545_vm15, %vm1142_vm3 }
  0xe0   :  { %v413_v31 = vand.u32 2147483647, %v410_v11  ;;  %v363_v2 = vand.u32 2147483647, %v360_v8 }
  0xe2   :  { %v1008_v19 = vpop.permute.xlu1 %418  ;;  %v416_v58 = vadd.f32 %v413_v31, %v388_v23  ;;  %v1150_v22 = vadd.f32 %v363_v2, %v341_v37 }
  0xe3   :  { %v433_v12 = vsub.f32 %v1008_v19, %v1055_v10  ;;  %v437_v19 = vand.u32 2147483647, %v434_v54 }
  0xe5   :  { %v436_v6 = vand.u32 2147483647, %v433_v12  ;;  %v440_v56 = vadd.f32 %v437_v19, %v415_v27  ;;  %v364_v12 = vadd.f32 %v361_v40, %v982_v3  ;;  %v95_v40 = vsel %vm1028_vm9, %v1159_v25, %v1010_v20 }
  0xe6   :  { %v1024_v26 = vpop.permute.xlu1 %426 }
  0xe7   :  { %v435_v32 = vsub.f32 %v1024_v26, %v1055_v10  ;;  %v439_v62 = vadd.f32 %v436_v6, %v414_v43  ;;  %v558_v55 = vadd.f32 %v440_v56, %v1111_v52 }
  0xe9   :  { %v438_v63 = vand.u32 2147483647, %v435_v32  ;;  %v1169_v19 = vmul.f32 0.5, %v558_v55 }
  0xeb   :  { %v1040_v35 = vpop.permute.xlu1 %443  ;;  %v441_v3 = vadd.f32 %v438_v63, %v416_v58 }
  0xec   :  { %v458_v11 = vsub.f32 %v1040_v35, %v1087_v1 }
  0xed   :  { %v559_v29 = vadd.f32 %v441_v3, %v1150_v22 }
  0xee   :  { %v461_v18 = vand.u32 2147483647, %v458_v11 }
  0xef   :  { %v1057_v45 = vpop.permute.xlu1 %447 }
  0xf4   :  { %v473_v14 = vpop.permute.xlu1 %472 }
  0xf5   :  { %v484_v9 = vsub.f32 %v473_v14, %v1065_v48  ;;  %v509_v14 = vsub.f32 %v1081_v60, %v1079_v59  ;;  %v557_v60 = vadd.f32 %v439_v62, %v364_v12 }
  0xf7   :  { %v689_v30 = vpop.f32.mrb[0].mxu0  ;;  %v487_v15 = vand.u32 2147483647, %v484_v9  ;;  %v512_v31 = vand.u32 2147483647, %v509_v14  ;;  %v560_v6 = vmul.f32 0.5, %v557_v60 }
  0xf8   :  { %v228_v34 = vmul.f32 2.0, %v689_v30  ;;  %v179_v5 = vpop.f32.mrb[1].mxu0  ;;  %v477_v36 = vpop.permute.xlu1 %476 }
  0xf9   :  { %v226_v41 = vmul.f32 2.0, %v179_v5  ;;  %v690_v50 = vpop.f32.mrb[2].mxu0  ;;  %v485_v16 = vsub.f32 %v477_v36, %v1065_v48  ;;  %v671_v5 = vadd.s32 4294967280, %v1010_v20 }
  0xfa   :  { %v231_v44 = vsub.f32 %v959_v53, %v228_v34  ;;  %v182_v46 = vpop.f32.mrb[3].mxu0  ;;  %v459_v53 = vsub.f32 %v1057_v45, %v1087_v1  ;;  %v460_v45 = vsub.f32 %v1037_v33, %v1087_v1 }
  0xfb   :  { %v229_v26 = vsub.f32 %v223_v7, %v226_v41  ;;  %v227_v10 = vmul.f32 2.0, %v182_v46  ;;  %v486_v7 = vand.u32 2147483647, %v483_v4  ;;  %v488_v34 = vand.u32 2147483647, %v485_v16 }
  0xfc   :  { %v1113_v0 = vmax.f32 %v231_v44, 0.0  ;;  %v462_v1 = vand.u32 2147483647, %v459_v53  ;;  %v463_v27 = vand.u32 2147483647, %v460_v45  ;;  %v118_v41 = vstv %s935_s24 }
  0xfd   :  { %v1124_v47 = vmax.f32 %v229_v26, 0.0  ;;  %v230_v54 = vsub.f32 %v224_v17, %v227_v10  ;;  %v494_v61 = vpop.permute.xlu1 %493  ;;  %v87_v17 = vstv %s932_s23  ;;  %v489_v36 = vadd.f32 %v486_v7, %v461_v18 }
  0xfe   :  { %749 = vrsqrt.f32 %v1113_v0  ;;  %v508_v33 = vsub.f32 %v494_v61, %v1079_v59  ;;  %v490_v32 = vadd.f32 %v487_v15, %v462_v1  ;;  %v88_v38 = vsel %vm1028_vm9, %v87_v17, %v64_v24 }
  0xff   :  { %751 = vrsqrt.f32 %v1124_v47  ;;  %v1146_v35 = vmax.f32 %v230_v54, 0.0  ;;  %v564_v44 = vsel %vm1165_vm4, %v1111_v52, %v1169_v19  ;;  %v562_v46 = vmul.f32 0.5, %v559_v29 }
 0x100   :  { %v511_v30 = vand.u32 2147483647, %v508_v33  ;;  %v515_v58 = vadd.f32 %v512_v31, %v490_v32  ;;  %vm251_vm11 = vcmp.eq.f32.partialorder %v1113_v0, inf  ;;  %v491_v63 = vadd.f32 %v488_v34, %v463_v27 }
 0x101   :  { %753 = vrsqrt.f32 %v1146_v35  ;;  %vm253_vm1 = vcmp.eq.f32.partialorder %v1113_v0, 0.0  ;;  %v254_v57 = vand.u32 2147483648, %v1113_v0  ;;  %vm237_vm2 = vcmp.eq.f32.partialorder %v1124_v47, inf }
 0x102   :  { %v526_v23 = vpop.permute.xlu1 %525  ;;  %v514_v56 = vadd.f32 %v511_v30, %v489_v36  ;;  %vm239_vm3 = vcmp.eq.f32.partialorder %v1124_v47, 0.0  ;;  %vm244_vm4 = vcmp.eq.f32.partialorder %v1146_v35, inf  ;;  %v247_v21 = vand.u32 2147483648, %v1146_v35 }
 0x103   :  { %vm533_vm6 = vcmp.eq.s32.totalorder %v526_v23, 1  ;;  %v567_v33 = vmul.f32 0.8, %v515_v58  ;;  %v1224_v18 = vsel %vm1046_vm12, %v118_v41, %v88_v38  ;;  %v570_v24 = vmul.f32 0.2, %v564_v44 }
 0x104   :  { %vm542_vm7 = vmand %vm533_vm6, %vm541_vm13  ;;  %v566_v11 = vmul.f32 0.8, %v514_v56 }
 0x105   :  { %vm549_vm8 = vmand %vm546_vm14, %vm542_vm7  ;;  %vm246_vm7 = vcmp.eq.f32.partialorder %v1146_v35, 0.0  ;;  %v573_v49 = vadd.f32 %v570_v24, %v567_v33 }
 0x106   :  { %vm1179_vm10 = vmor %vm545_vm15, %vm549_vm8 }
 0x107   :  { %v563_v50 = vsel %vm1179_vm10, %v364_v12, %v560_v6  ;;  %v502_v8 = vpop.permute.xlu1 %501 }
 0x108   :  { %v750_v43 = vpop.eup %749  ;;  %v510_v26 = vsub.f32 %v502_v8, %v1079_v59  ;;  %v569_v9 = vmul.f32 0.2, %v563_v50  ;;  %v240_v59 = vand.u32 2147483648, %v1124_v47  ;;  %v803_v50 = vmov (!%p676_p13), 0.0  }
 0x109   :  { %v752_v10 = vpop.eup %751  ;;  %v250_v62 = vmul.f32 %v750_v43, %v1113_v0 }
 0x10a   :  { %v236_v53 = vmul.f32 %v752_v10, %v1124_v47  ;;  %v513_v54 = vand.u32 2147483647, %v510_v26  ;;  %v572_v3 = vadd.f32 %v569_v9, %v566_v11 }
 0x10b   :  { %v252_v52 = vsel %vm251_vm11, %v1113_v0, %v250_v62  ;;  %v754_v61 = vpop.eup %753 }
 0x10c   :  { %v255_v2 = vsel %vm253_vm1, %v254_v57, %v252_v52  ;;  %v238_v4 = vsel %vm237_vm2, %v1124_v47, %v236_v53  ;;  %v532_v12 = vpop.permute.xlu1 %531  ;;  %v243_v55 = vmul.f32 %v754_v61, %v1146_v35  ;;  %v516_v47 = vadd.f32 %v513_v54, %v491_v63 }
 0x10d   :  { %v258_v45 = vmul.f32 -0.5, %v255_v2  ;;  %v241_v14 = vsel %vm239_vm3, %v240_v59, %v238_v4  ;;  %vm535_vm6 = vcmp.eq.s32.totalorder %v532_v12, 1  ;;  %v577_v25 = vsel %vm52_vm5, %v572_v3, 0.0 }
 0x10e   :  { %v256_v0 = vmul.f32 -0.5, %v241_v14  ;;  %v245_v60 = vsel %vm244_vm4, %v1146_v35, %v243_v55  ;;  %vm544_vm8 = vmand %vm535_vm6, %vm541_vm13  ;;  %v1228_v35 = vsel %vm1046_vm12, %v671_v5, %v95_v40  ;;  %vm1233_vm13 = vcmp.lt.s32.totalorder %v956_v51, %v63_v13 }
 0x10f   :  { %v284_v1 = vmul.f32 1.442695, %v258_v45  ;;  %v248_v7 = vsel %vm246_vm7, %v247_v21, %v245_v60  ;;  %vm551_vm10 = vmand %vm546_vm14, %vm544_vm8  ;;  %v568_v27 = vmul.f32 0.8, %v516_v47  ;;  %vm265_vm14 = vcmp.lt.s32.totalorder %v1228_v35, %v1224_v18 }
 0x110   :  { %v280_v15 = vmul.f32 1.442695, %v256_v0  ;;  %v578_v16 = vsel %vm52_vm5, %v256_v0, 0.0  ;;  %v257_v23 = vmul.f32 -0.5, %v248_v7  ;;  %vm556_vm11 = vmor %vm545_vm15, %vm551_vm10  ;;  %vm263_vm15 = vcmp.lt.s32.totalorder %v956_v51, %v87_v17 }
 0x111   :  { %v565_v48 = vsel %vm556_vm11, %v1150_v22, %v562_v46  ;;  %v582_v22 = vsel %vm1028_vm9, %v573_v49, %v577_v25  ;;  %vm259_vm1 = vcmp.ne.s32.totalorder %v956_v51, %v1228_v35  ;;  %vm274_vm2 = vmand %vm1233_vm13, %vm265_vm14  ;;  %vm264_vm3 = vcmp.lt.s32.totalorder %v956_v51, %v118_v41 }
 0x112   :  { %755 = vpow2.f32 %v280_v15  ;;  %v282_v19 = vmul.f32 1.442695, %v257_v23  ;;  %v583_v13 = vsel %vm1028_vm9, %v257_v23, %v578_v16  ;;  %v571_v29 = vmul.f32 0.2, %v565_v48  ;;  %vm275_vm4 = vmand %vm263_vm15, %vm265_vm14 }
 0x113   :  { %757 = vpow2.f32 %v284_v1  ;;  %v588_v30 = vsel %vm1046_vm12, %v258_v45, %v583_v13  ;;  %vm277_vm6 = vmand %vm259_vm1, %vm274_vm2  ;;  %v811_v41 = vmov 0.0  }
 0x114   :  { %759 = vpow2.f32 %v282_v19  ;;  %591 = vst.msk [vmem:[#allocation3] sm:$0xff] %vm209_vm0, %v588_v30  ;;  %v574_v31 = vadd.f32 %v571_v29, %v568_v27  ;;  %vm276_vm7 = vmand %vm264_vm3, %vm265_vm14 }
 0x115   :  { %vm278_vm8 = vmand %vm259_vm1, %vm275_vm4 }
 0x116   :  { %v587_v6 = vsel %vm1046_vm12, %v574_v31, %v582_v22  ;;  %vm279_vm10 = vmand %vm259_vm1, %vm276_vm7 }
 0x117   :  { %590 = vst.msk [vmem:[#allocation2] sm:$0xff] %vm209_vm0, %v587_v6 }
 0x11b   :  { %659 = sbr.rel (%p676_p13) target bundleno = 330 (0x14a), region = 39 }
 0x11c   :  { %v756_v17 = vpop.eup %755 }
 0x11d   :  { %v286_v32 = vsel %vm277_vm6, %v756_v17, 0.0  ;;  %v758_v34 = vpop.eup %757 }
 0x11e   :  { %v579_v5 = vsel %vm52_vm5, %v286_v32, 0.0  ;;  %v760_v51 = vpop.eup %759  ;;  %v288_v37 = vsel %vm279_vm10, %v758_v34, 0.0 }
 0x11f   :  { %v287_v36 = vsel %vm278_vm8, %v760_v51, 0.0 }
 0x120   :  { %v584_v38 = vsel %vm1028_vm9, %v287_v36, %v579_v5 }
 0x121   :  { %v589_v40 = vsel %vm1046_vm12, %v288_v37, %v584_v38 }
 0x122 LB: > { %s599_s7 = scalar_lea.vmem [#allocation2], %s809_s5  ;;  %v620_v58 = vstv %s809_s5  ;;  %s601_s8 = scalar_lea.vmem [#allocation3], %s809_s5  ;;  %s809_s5 = sphi %s1280_s5, %s595_s5   ;;  %v805_v50 = vphi %v803_v50, %v804_v50  }
 0x123   : > { %v677_v20 = vld [vmem:[%s599_s7] ss:$0 sm:$0xff]  ;;  %vm622_vm9 = vcmp.lt.s32.totalorder %v620_v58, %v1224_v18  ;;  %vm621_vm12 = vcmp.ne.s32.totalorder %v1228_v35, %v620_v58  ;;  %s595_s5 = sadd.s32 1, %s809_s5  }
 0x124   : > { %vm607_vm5 = vcmp.ge.f32.partialorder %v587_v6, %v677_v20  ;;  %v602_v63 = vld [vmem:[%s601_s8] sm:$0x1]  ;;  %vm623_vm13 = vmand %vm265_vm14, %vm622_vm9  ;;  %p594_p0 = scmp.ge.s32.totalorder %s595_s5, %s1327_s25 }
 0x125   : > { %v608_v28 = vsel %vm607_vm5, %v589_v40, 0.0  ;;  %vm624_vm11 = vmand %vm621_vm12, %vm623_vm13 }
 0x126   : > { %v609_v39 = vsel %vm209_vm0, %v608_v28, 0.0 }
 0x127   : > { %v610_v8 = vrot.slane %v609_v39, 4 }
 0x129   : > { %v611_v43 = vadd.f32 %v610_v8, %v609_v39 }
 0x12b   : > { %v612_v44 = vrot.slane %v611_v43, 2 }
 0x12d   : > { %v613_v46 = vadd.f32 %v612_v44, %v611_v43 }
 0x12f   : > { %v614_v56 = vrot.slane %v613_v46, 1 }
 0x131   : > { %v615_v26 = vadd.f32 %v614_v56, %v613_v46 }
 0x133   : > { %v616_v10 = vmax.f32 %v615_v26, 1e-30 }
 0x135   : > { %761 = vlog2.f32 %v616_v10 }
 0x13f   : > { %v762_v62 = vpop.eup %761 }
 0x140   : > { %v618_v57 = vmul.f32 0.6931472, %v762_v62 }
 0x142   : > { %v619_v53 = vsub.f32 %v602_v63, %v618_v57 }
 0x143   :  { %597 = sbr.rel (!%p594_p0) target bundleno = 290 (0x122), region = 45 }
 0x144   : > { %v625_v9 = vsub.f32 0.0, %v619_v53 }
 0x146   : > { %v626_v52 = vsel %vm624_vm11, %v625_v9, 0.0 }
 0x147   : > { %v627_v59 = vadd.f32 %v805_v50, %v626_v52  }
 0x149   : > { %v804_v50 = vmov %v627_v59   ;;  %v812_v41 = vmov (%p594_p0), %v627_v59  }
 0x14a PF:  { %v628_v54 = vcvt.s32.f32 %v1224_v18  ;;  %vm629_vm15 = vcmp.ge.s32.totalorder %v1224_v18, 2  ;;  %vm637_vm1 = vcmask 188416   ;;  %v813_v41 = vphi %v811_v41, %v812_v41  }
 0x14c   :  { %v678_v61 = vadd.f32 -1.0, %v628_v54 }
 0x14e   :  { %v631_v2 = vmul.f32 %v678_v61, %v628_v54 }
 0x150   :  { %v632_v4 = vmax.f32 %v631_v2, 1.0 }
 0x152   :  { %763 = vrcp.f32 %v632_v4 }
 0x15c   :  { %v764_v11 = vpop.eup %763 }
 0x15d   :  { %v635_v12 = vsel %vm629_vm15, %v764_v11, 0.0 }
 0x15e   :  { %v636_v45 = vmul.f32 %v813_v41, %v635_v12 }
 0x160   :  { %v638_v14 = vsel %vm637_vm1, %v636_v45, 0.0 }
 0x161   :  { %639 = vadd.xlane.f32.xlu0 %v638_v14 }
 0x1ee   :  { %v640_v55 = vpop.xlane.xlu0 %639 }
 0x1ef   :  { %v641_v0 = vrot.slane %v640_v55, 4 }
 0x1f1   :  { %v642_v21 = vadd.f32 %v641_v0, %v640_v55 }
 0x1f3   :  { %v643_v3 = vrot.slane %v642_v21, 2 }
 0x1f5   :  { %v644_v33 = vadd.f32 %v643_v3, %v642_v21 }
 0x1f7   :  { %v645_v60 = vrot.slane %v644_v33, 1 }
 0x1f9   :  { %v646_v47 = vadd.f32 %v645_v60, %v644_v33 }
 0x1fb   :  { %691 = vpush %v646_v47 }
 0x22c   :  { %s692_s9 = spop %691 }
 0x22d   :  { %v648_v1 = vstv %s692_s9 }
 0x22e   :  { %649 = vst [vmem:[%s1308_s6] sm:$0x1] %v648_v1 }

</bundles_post_ra>
